<compile_context>
chip_gen: v7x
topology: tpu7x:2x2x1
jax: 0.10.0
libtpu: 0.0.40
codegen_flags: <defaults>
</compile_context>

<pallas_src>
import functools

import jax
import jax.numpy as jnp
from jax import lax
from jax.experimental import pallas as pl
from jax.experimental.pallas import tpu as pltpu

# Big-but-finite mask value: exp(mask - m) underflows to 0 and we never form
# inf - inf (the reference -finfo.max behaves identically after softmax).
_MASK_VALUE = -1e30


# ---------------------------------------------------------------------------
# Helpers
# ---------------------------------------------------------------------------

def _const_spec(shape, index_map):
    """BlockSpec for constant-index (weight) operands: single-buffer them to
    halve their VMEM footprint; fall back to the default if the installed JAX
    does not support pipeline_mode / Buffered."""
    try:
        return pl.BlockSpec(shape, index_map, pipeline_mode=pl.Buffered(1))
    except Exception:  # pragma: no cover - older JAX
        return pl.BlockSpec(shape, index_map)


def _pick_tile(n):
    # 128 keeps the f32 (gh, tq, tk) score tile small enough for v7x's 64 MiB
    # VMEM at large head counts; awkward lengths fall back to a full-row tile.
    # TODO(synk): pad / pack tiny n so the lane axis is a >=128 multiple.
    return 128 if n % 128 == 0 else n


def _vmem_limit_bytes(C, inner, gh, d, tq, tk, cdt, head_dt):
    cs = jnp.dtype(cdt).itemsize
    hs = jnp.dtype(head_dt).itemsize
    weights = (inner * C + 2 * inner * C + C * inner) * cs + C * 4
    io = 2 * (C * tq * cs + 2 * inner * tk * hs + C * tq * 4)      # double-buffered blocks
    scratch = gh * tq * d * hs + 2 * gh * tq * 128 * 4 + gh * tq * d * 4
    live = 2 * gh * tq * tk * 4                                    # sim + p (f32)
    est = int(1.5 * (weights + io + scratch + live))
    return max(32 * 1024 * 1024, min(est, 96 * 1024 * 1024))


# ---------------------------------------------------------------------------
# Kernel bodies
# ---------------------------------------------------------------------------

def _kv_proj_kernel(ctx_ref, wkv_ref, k_ref, v_ref, *, inner):
    """1x1 conv == channel matmul: one wide MXU dot, then split K / V on the
    major axis (free)."""
    kv = jnp.dot(wkv_ref[...], ctx_ref[0], preferred_element_type=jnp.float32)
    kv = kv.astype(k_ref.dtype)
    k_ref[0] = kv[:inner]
    v_ref[0] = kv[inner:]


def _flash_attn_kernel(x_ref, k_ref, v_ref, wq_ref, wo_ref, bo_ref, o_ref,
                       q_sc, m_sc, l_sc, acc_sc, *, gh, d, tq, tk, causal):
    qi = pl.program_id(1)
    ki = pl.program_id(2)
    head_dt = q_sc.dtype

    @pl.when(ki == 0)
    def _init():
        # Fused Q projection (dim_head**-0.5 already folded into wq on host),
        # computed once per q tile and cached in VMEM scratch.
        q = jnp.dot(wq_ref[...], x_ref[0], preferred_element_type=jnp.float32)
        q3 = q.reshape(gh, d, tq).astype(head_dt)    # free: splits the major dim
        q_sc[...] = jnp.swapaxes(q3, 1, 2)           # (gh, tq, d): once per q tile
        m_sc[...] = jnp.full(m_sc.shape, _MASK_VALUE, m_sc.dtype)
        l_sc[...] = jnp.zeros(l_sc.shape, l_sc.dtype)
        acc_sc[...] = jnp.zeros(acc_sc.shape, acc_sc.dtype)

    def _update():
        k3 = k_ref[0].reshape(gh, d, tk)             # free reshapes, no transposes
        v3 = v_ref[0].reshape(gh, d, tk)
        # sim[h,i,j] = sum_d q[h,i,d] * k[h,d,j]  (batched MXU matmul, f32 acc)
        sim = jnp.einsum("hid,hdj->hij", q_sc[...], k3,
                         preferred_element_type=jnp.float32)
        if causal:
            rows = qi * tq + lax.broadcasted_iota(jnp.int32, sim.shape, 1)
            cols = ki * tk + lax.broadcasted_iota(jnp.int32, sim.shape, 2)
            sim = jnp.where(cols > rows, _MASK_VALUE, sim)
        m_prev = m_sc[...]
        m_new = jnp.maximum(m_prev, jnp.max(sim, axis=-1, keepdims=True))
        alpha = jnp.exp(m_prev - m_new)              # (gh, tq, 1)
        p = jnp.exp(sim - m_new)                     # unnormalised probabilities
        l_sc[...] = alpha * l_sc[...] + jnp.sum(p, axis=-1, keepdims=True)
        # q-major accumulator so alpha / inv broadcast along the minor dim with
        # no per-step relayout; normalisation happens once after the kv loop.
        pv = jnp.einsum("hij,hdj->hid", p.astype(head_dt), v3,
                        preferred_element_type=jnp.float32)
        acc_sc[...] = alpha * acc_sc[...] + pv
        m_sc[...] = m_new

    if causal:
        # Fully-masked kv tiles: compute is skipped here; their DMA was already
        # elided by the clamped index_map in the wrapper.
        pl.when(ki * tk <= qi * tq + (tq - 1))(_update)
    else:
        _update()

    @pl.when(ki == pl.num_programs(2) - 1)
    def _finalize():
        inv = pl.reciprocal(l_sc[...], approx=True)  # EUP slot, not a VALU divide
        out = acc_sc[...] * inv                      # (gh, tq, d)
        out = jnp.swapaxes(out, 1, 2).reshape(gh * d, tq)   # '(g h) d n -> (g h d) n'
        out = out.astype(wo_ref.dtype)
        # Fused output 1x1 conv + bias, written once per q tile.
        y = jnp.dot(wo_ref[...], out, preferred_element_type=jnp.float32) + bo_ref[...]
        o_ref[0] = y.astype(o_ref.dtype)


# ---------------------------------------------------------------------------
# Parameter prep (host side, once per model — not per forward call)
# ---------------------------------------------------------------------------

def prepare_params(params, *, dim_head, compute_dtype=jnp.bfloat16):
    cdt = jnp.dtype(compute_dtype)
    scale = dim_head ** (-0.5)
    return {
        "wq_c": (params["wq"] * scale).astype(cdt),              # (inner, C), scale folded
        "wkv_c": params["wkv"].astype(cdt),                      # (2*inner, C)
        "wo_c": params["wo"].astype(cdt),                        # (C, inner)
        "bo_c": params["bo"].reshape(-1, 1).astype(jnp.float32),  # (C, 1)
    }


# ---------------------------------------------------------------------------
# Module forward
# ---------------------------------------------------------------------------

def attention_forward(x, params, *, dim, dim_head, heads, groups, causal=False,
                      context=None, mask=None, compute_dtype=jnp.bfloat16,
                      q_block=None, kv_block=None):
    # TODO(synk): optional boolean padding `mask` path of the module is not
    #             implemented (default forward uses mask=None).
    if mask is not None:
        raise NotImplementedError("boolean `mask` path not implemented")

    b, C, n = x.shape
    assert C == dim * groups, "x channels must equal dim * groups"
    gh = groups * heads
    inner = dim_head * gh

    ctx = x if context is None else context
    assert ctx.shape[0] == b and ctx.shape[1] == C
    n_ctx = ctx.shape[2]

    cdt = jnp.dtype(compute_dtype)
    # bf16 per-head tensors only when dim_head fills a bf16 (16,128) packing
    # tile; otherwise keep the head-split tensors in f32 (avoids hidden copies).
    head_dt = cdt if (cdt == jnp.dtype(jnp.float32) or dim_head % 16 == 0) \
        else jnp.dtype(jnp.float32)

    prep = params if "wq_c" in params else prepare_params(
        params, dim_head=dim_head, compute_dtype=cdt)

    tq = _pick_tile(n) if q_block is None else q_block
    tk = _pick_tile(n_ctx) if kv_block is None else kv_block
    assert n % tq == 0 and (tq == n or tq % 128 == 0)
    assert n_ctx % tk == 0 and (tk == n_ctx or tk % 128 == 0)
    nq, nk = n // tq, n_ctx // tk

    x_c = x.astype(cdt)
    ctx_c = ctx.astype(cdt)

    vmem_limit = _vmem_limit_bytes(C, inner, gh, dim_head, tq, tk, cdt, head_dt)

    # ---- 1) K/V projection: one pass over the context (not per q tile). ----
    k_arr, v_arr = pl.pallas_call(
        functools.partial(_kv_proj_kernel, inner=inner),
        grid=(b, nk),
        in_specs=[
            pl.BlockSpec((1, C, tk), lambda bb, kk: (bb, 0, kk)),
            _const_spec((2 * inner, C), lambda bb, kk: (0, 0)),
        ],
        out_specs=[
            pl.BlockSpec((1, inner, tk), lambda bb, kk: (bb, 0, kk)),
            pl.BlockSpec((1, inner, tk), lambda bb, kk: (bb, 0, kk)),
        ],
        out_shape=[
            jax.ShapeDtypeStruct((b, inner, n_ctx), head_dt),
            jax.ShapeDtypeStruct((b, inner, n_ctx), head_dt),
        ],
        compiler_params=pltpu.CompilerParams(
            dimension_semantics=("parallel", "parallel"),
            vmem_limit_bytes=vmem_limit),
    )(ctx_c, prep["wkv_c"])

    # ---- 2) Flash attention + fused Q projection + fused output conv. ----
    if causal:
        # Clamp the kv block index to the last causally-relevant tile: once the
        # index stops changing, Pallas elides the DMA for the skipped tiles.
        def kv_map(bb, qi, ki):
            return (bb, 0, jnp.minimum(ki, (qi * tq + tq - 1) // tk))
    else:
        def kv_map(bb, qi, ki):
            return (bb, 0, ki)

    out = pl.pallas_call(
        functools.partial(_flash_attn_kernel, gh=gh, d=dim_head, tq=tq, tk=tk,
                          causal=causal),
        grid=(b, nq, nk),
        in_specs=[
            pl.BlockSpec((1, C, tq), lambda bb, qi, ki: (bb, 0, qi)),
            pl.BlockSpec((1, inner, tk), kv_map),
            pl.BlockSpec((1, inner, tk), kv_map),
            _const_spec((inner, C), lambda bb, qi, ki: (0, 0)),
            _const_spec((C, inner), lambda bb, qi, ki: (0, 0)),
            _const_spec((C, 1), lambda bb, qi, ki: (0, 0)),
        ],
        out_specs=pl.BlockSpec((1, C, tq), lambda bb, qi, ki: (bb, 0, qi)),
        out_shape=jax.ShapeDtypeStruct((b, C, n), x.dtype),
        scratch_shapes=[
            pltpu.VMEM((gh, tq, dim_head), head_dt),     # cached q tile per head
            pltpu.VMEM((gh, tq, 1), jnp.float32),        # running max m
            pltpu.VMEM((gh, tq, 1), jnp.float32),        # running sum l
            pltpu.VMEM((gh, tq, dim_head), jnp.float32),  # unnormalised output acc
        ],
        compiler_params=pltpu.CompilerParams(
            dimension_semantics=("parallel", "parallel", "arbitrary"),
            vmem_limit_bytes=vmem_limit),
    )(x_c, k_arr, v_arr, prep["wq_c"], prep["wo_c"], prep["bo_c"])
    return out


# ---------------------------------------------------------------------------
# Parameters + pure-JAX reference (for correctness checks)
# ---------------------------------------------------------------------------

def init_params(key, *, dim, dim_head, heads, groups):
    input_dim = dim * groups
    inner_dim = dim_head * heads * groups
    k1, k2, k3, k4 = jax.random.split(key, 4)
    wq = jax.random.normal(k1, (inner_dim, input_dim), jnp.float32) * (input_dim ** -0.5)
    wkv = jax.random.normal(k2, (2 * inner_dim, input_dim), jnp.float32) * (input_dim ** -0.5)
    wo = jax.random.normal(k3, (input_dim, inner_dim), jnp.float32) * (inner_dim ** -0.5)
    bo = jax.random.normal(k4, (input_dim,), jnp.float32) * 0.01
    return dict(wq=wq, wkv=wkv, wo=wo, bo=bo)


def attention_reference(x, params, *, dim, dim_head, heads, groups, causal=False,
                        context=None):
    b, input_dim, n = x.shape
    ctx = x if context is None else context
    nk = ctx.shape[2]
    inner_dim = dim_head * heads * groups
    scale = dim_head ** (-0.5)

    q = jnp.einsum("oc,bcn->bon", params["wq"], x)
    kv = jnp.einsum("oc,bcn->bon", params["wkv"], ctx)
    k, v = kv[:, :inner_dim, :], kv[:, inner_dim:, :]

    def to_bhnd(t, length):
        t = t.reshape(b, groups, heads, dim_head, length)
        return jnp.transpose(t, (0, 1, 2, 4, 3)).reshape(
            b * groups * heads, length, dim_head)

    qh = to_bhnd(q, n) * scale
    kh, vh = to_bhnd(k, nk), to_bhnd(v, nk)
    sim = jnp.einsum("bid,bjd->bij", qh, kh)
    if causal:
        cm = jnp.triu(jnp.ones((n, nk), bool), 1)
        sim = jnp.where(cm[None], -jnp.finfo(sim.dtype).max, sim)
    attn = jax.nn.softmax(sim, axis=-1)
    out = jnp.einsum("bij,bjd->bid", attn, vh)
    out = out.reshape(b, groups, heads, n, dim_head)
    out = jnp.transpose(out, (0, 1, 2, 4, 3)).reshape(b, groups * heads * dim_head, n)
    return jnp.einsum("oc,bcn->bon", params["wo"], out) + params["bo"][None, :, None]


# ---------------------------------------------------------------------------
# Main
# ---------------------------------------------------------------------------

if __name__ == "__main__":
    dim, dim_head, heads, groups = 16, 8, 4, 2          # C = 32, inner = 64, gh = 8
    b = 2
    key = jax.random.PRNGKey(0)
    kx, kx2, kctx, kp = jax.random.split(key, 4)
    params = init_params(kp, dim=dim, dim_head=dim_head, heads=heads, groups=groups)
    common = dict(dim=dim, dim_head=dim_head, heads=heads, groups=groups)

    # Tolerances: approx EUP reciprocal adds ~1e-3 relative error (f32 tests);
    # the bf16 MXU path adds a few extra percent of drift.
    TOL_F32 = 2e-2
    TOL_BF16 = 8e-2

    # 1) tiny sequence (single tile, degenerate flash loop), f32 compute
    x_small = jax.random.normal(kx, (b, dim * groups, 8), jnp.float32)
    out = attention_forward(x_small, params, **common, causal=False,
                            compute_dtype=jnp.float32)
    out = jax.block_until_ready(out)
    ref = attention_reference(x_small, params, **common, causal=False)
    assert out.shape == ref.shape
    assert jnp.allclose(out, ref, atol=TOL_F32, rtol=TOL_F32), "mismatch (small, non-causal)"

    # 2) multi-tile causal: exercises online softmax across kv tiles + tile skip
    x_long = jax.random.normal(kx2, (b, dim * groups, 256), jnp.float32)
    out_c = attention_forward(x_long, params, **common, causal=True,
                              compute_dtype=jnp.float32, q_block=128, kv_block=128)
    out_c = jax.block_until_ready(out_c)
    ref_c = attention_reference(x_long, params, **common, causal=True)
    assert jnp.allclose(out_c, ref_c, atol=TOL_F32, rtol=TOL_F32), "mismatch (causal)"

    # 3) bf16 MXU path with weights prepared once and reused
    prep_bf16 = prepare_params(params, dim_head=dim_head, compute_dtype=jnp.bfloat16)
    out_b = attention_forward(x_long, prep_bf16, **common, causal=False)
    out_b = jax.block_until_ready(out_b)
    ref_b = attention_reference(x_long, params, **common, causal=False)
    assert jnp.allclose(out_b, ref_b, atol=TOL_BF16, rtol=TOL_BF16), "mismatch (bf16)"

    # 4) cross-attention with a different-length context
    ctx = jax.random.normal(kctx, (b, dim * groups, 128), jnp.float32)
    out_x = attention_forward(x_small, params, **common, causal=False, context=ctx,
                              compute_dtype=jnp.float32)
    out_x = jax.block_until_ready(out_x)
    ref_x = attention_reference(x_small, params, **common, causal=False, context=ctx)
    assert jnp.allclose(out_x, ref_x, atol=TOL_F32, rtol=TOL_F32), "mismatch (context)"

    print("KERNEL_OK")
</pallas_src>

<mosaic_0001>
module attributes {stable_mosaic.version = 11 : i64} {
  func.func @_kv_proj_kernel(%arg0: i32, %arg1: i32, %arg2: memref<1x32x8xf32, #tpu.memory_space<vmem>>, %arg3: memref<128x32xf32, #tpu.memory_space<vmem>>, %arg4: memref<1x64x8xf32, #tpu.memory_space<vmem>>, %arg5: memref<1x64x8xf32, #tpu.memory_space<vmem>>) attributes {dimension_semantics = [#tpu.dimension_semantics<parallel>, #tpu.dimension_semantics<parallel>], iteration_bounds = array<i64: 2, 1>, scalar_prefetch = 0 : i64, scratch_operands = 0 : i64, tpu.core_type = #tpu.core_type<tc>, window_params = [{transform_indices = @transform_0, window_bounds = array<i64: 1, 32, 8>}, {pipeline_mode = #tpu.pipeline_mode<synchronous>, transform_indices = @transform_1, window_bounds = array<i64: 128, 32>}, {transform_indices = @transform_2, window_bounds = array<i64: 1, 64, 8>}, {transform_indices = @transform_3, window_bounds = array<i64: 1, 64, 8>}]} {
    %c0 = arith.constant 0 : index
    %c0_0 = arith.constant 0 : index
    %0 = vector.load %arg3[%c0, %c0_0] : memref<128x32xf32, #tpu.memory_space<vmem>>, vector<128x32xf32>
    %c0_1 = arith.constant 0 : index
    %c0_2 = arith.constant 0 : index
    %c0_3 = arith.constant 0 : index
    %1 = vector.load %arg2[%c0_1, %c0_2, %c0_3] : memref<1x32x8xf32, #tpu.memory_space<vmem>>, vector<1x32x8xf32>
    %2 = vector.shape_cast %1 : vector<1x32x8xf32> to vector<32x8xf32>
    %cst = arith.constant dense<0.000000e+00> : vector<128x8xf32>
    %3 = tpu.matmul %0, %2, %cst {dimension_numbers = #tpu.dot_dimension_numbers<[1], [0], [0], [1], [0, 0, 1, 1], [], []>} : vector<128x32xf32>, vector<32x8xf32>, vector<128x8xf32> -> vector<128x8xf32>
    %4 = vector.extract_strided_slice %3 {offsets = [0, 0], sizes = [64, 8], strides = [1, 1]} : vector<128x8xf32> to vector<64x8xf32>
    %c0_4 = arith.constant 0 : index
    %c0_5 = arith.constant 0 : index
    %c0_6 = arith.constant 0 : index
    %5 = vector.load %arg4[%c0_4, %c0_5, %c0_6] : memref<1x64x8xf32, #tpu.memory_space<vmem>>, vector<1x64x8xf32>
    %6 = vector.shape_cast %5 : vector<1x64x8xf32> to vector<64x8xf32>
    %7 = vector.shape_cast %4 : vector<64x8xf32> to vector<1x64x8xf32>
    tpu.vector_store %arg4[%c0_4, %c0_5, %c0_6], %7 {strides = array<i32>} : memref<1x64x8xf32, #tpu.memory_space<vmem>>, vector<1x64x8xf32>,
    %8 = vector.extract_strided_slice %3 {offsets = [64, 0], sizes = [64, 8], strides = [1, 1]} : vector<128x8xf32> to vector<64x8xf32>
    %c0_7 = arith.constant 0 : index
    %c0_8 = arith.constant 0 : index
    %c0_9 = arith.constant 0 : index
    %9 = vector.load %arg5[%c0_7, %c0_8, %c0_9] : memref<1x64x8xf32, #tpu.memory_space<vmem>>, vector<1x64x8xf32>
    %10 = vector.shape_cast %9 : vector<1x64x8xf32> to vector<64x8xf32>
    %11 = vector.shape_cast %8 : vector<64x8xf32> to vector<1x64x8xf32>
    tpu.vector_store %arg5[%c0_7, %c0_8, %c0_9], %11 {strides = array<i32>} : memref<1x64x8xf32, #tpu.memory_space<vmem>>, vector<1x64x8xf32>,
    return
  }
  func.func @transform_0(%arg0: i32, %arg1: i32) -> (i32, i32, i32) {
    %c0_i32 = arith.constant 0 : i32
    %c0_i32_0 = arith.constant 0 : i32
    return %arg0, %c0_i32, %arg1 : i32, i32, i32
  }
  func.func @transform_1(%arg0: i32, %arg1: i32) -> (i32, i32) {
    %c0_i32 = arith.constant 0 : i32
    %c0_i32_0 = arith.constant 0 : i32
    %c0_i32_1 = arith.constant 0 : i32
    return %c0_i32, %c0_i32_0 : i32, i32
  }
  func.func @transform_2(%arg0: i32, %arg1: i32) -> (i32, i32, i32) {
    %c0_i32 = arith.constant 0 : i32
    %c0_i32_0 = arith.constant 0 : i32
    return %arg0, %c0_i32, %arg1 : i32, i32, i32
  }
  func.func @transform_3(%arg0: i32, %arg1: i32) -> (i32, i32, i32) {
    %c0_i32 = arith.constant 0 : i32
    %c0_i32_0 = arith.constant 0 : i32
    return %arg0, %c0_i32, %arg1 : i32, i32, i32
  }
}

</mosaic_0001>

<bundles_post_ra>
// kernel: tpu_custom_call.1
= control target key start
LH: loop header
LB: loop body
LE: loop exit
PB: predicated region body
PF: predicated region fallthrough
CT: control target
= control target key end

     0   :  { %s748_s12 = smov 0   ;;  %s750_s13 = smov 0   ;;  %s888_s0 = inlined_call_operand.vmem [shape: f32[2,32,8], index: 0, kind: input, shape index: {}]   ;;  %s889_s1 = inlined_call_operand.vmem [shape: f32[128,32], index: 1, kind: input, shape index: {}]   ;;  %s890_s2 = inlined_call_operand.vmem [shape: f32[2,64,8], index: 2, kind: output, shape index: {0}]   ;;  %s891_s3 = inlined_call_operand.vmem [shape: f32[2,64,8], index: 3, kind: output, shape index: {1}]  }
   0x1   :  { %s752_s14 = smov 0  }
   0x2 LB: > { %s26_s15 = sadd.s32 1, %s722_s13  ;;  %p588_p0 = scmp.ge.s32.totalorder %s726_s14, 1  ;;  %s726_s14 = sphi %s752_s14, %s14_s14   ;;  %s722_s13 = sphi %s750_s13, %s893_s13   ;;  %s718_s12 = sphi %s748_s12, %s892_s12  }
   0x3   : > { %p28_p1 = scmp.ge.s32.totalorder %s26_s15, 2  ;;  %p161_p2 = scmp.lt.s32.totalorder %s726_s14, 3 }
   0x5   : > { %s895_s15 = smov (%p28_p1, %s26_s15), 0  ;;  %p162_p3 = pnand %p588_p0, %p161_p2 }
   0x6   : > { %p199_p4 = scmp.lt.s32.totalorder (!%p162_p3), %s718_s12, 1  ;;  %v223_v0 = vld [vmem:[%s889_s1] sm:$0xff] (!%p162_p3)  ;;  %vm243_vm0 = vcmask (!%p162_p3), 261120   ;;  %v224_v8 = vld [vmem:[%s889_s1 + $0x8] sm:$0xff] (!%p162_p3)  ;;  %v225_v10 = vld [vmem:[%s889_s1 + $0x10] sm:$0xff] (!%p162_p3)  ;;  %vm437_vm1 = vcmask (!%p162_p3), 64512  }
   0x7   : > { %165 = sbr.rel (%p162_p3) target bundleno = 254 (0xfe), region = 28  ;;  %v231_v1 = vld [vmem:[%s889_s1 + $0x40] sm:$0xff] (!%p162_p3)  ;;  %644 = vmatprep.mubr.msk.f32.mxu0 (!%p162_p3), %vm243_vm0, %v223_v0  ;;  %v232_v9 = vld [vmem:[%s889_s1 + $0x48] sm:$0xff] (!%p162_p3)  ;;  %v233_v11 = vld [vmem:[%s889_s1 + $0x50] sm:$0xff] (!%p162_p3) }
   0x8   : > { %656 = vmatprep.mubr.msk.f32.mxu1 (!%p162_p3), %vm243_vm0, %v231_v1  ;;  %v226_v12 = vld [vmem:[%s889_s1 + $0x18] sm:$0xff] (!%p162_p3)  ;;  %v227_v14 = vld [vmem:[%s889_s1 + $0x20] sm:$0xff] (!%p162_p3)  ;;  %v228_v16 = vld [vmem:[%s889_s1 + $0x28] sm:$0xff] (!%p162_p3) }
   0x9   : > { %v234_v13 = vld [vmem:[%s889_s1 + $0x58] sm:$0xff] (!%p162_p3)  ;;  %v235_v15 = vld [vmem:[%s889_s1 + $0x60] sm:$0xff] (!%p162_p3)  ;;  %v236_v17 = vld [vmem:[%s889_s1 + $0x68] sm:$0xff] (!%p162_p3) }
   0xa   : > { %v229_v18 = vld [vmem:[%s889_s1 + $0x30] sm:$0xff] (!%p162_p3)  ;;  %v230_v20 = vld [vmem:[%s889_s1 + $0x38] sm:$0xff] (!%p162_p3) }
   0xb   : > { %v237_v19 = vld [vmem:[%s889_s1 + $0x70] sm:$0xff] (!%p162_p3)  ;;  %v238_v21 = vld [vmem:[%s889_s1 + $0x78] sm:$0xff] (!%p162_p3) }
   0xe   : > { %s897_s12 = smov (!%p199_p4, %s718_s12), 1 }
   0xf   : > { %s613_s20 = sshll.u32 %s897_s12, 5  ;;  %s614_s29 = sshll.u32 %s897_s12, 6 }
  0x10   : > { %s206_s23 = scalar_lea.vmem %s888_s0, %s613_s20  ;;  %s840_s5 = scalar_lea.vmem %s890_s2, %s614_s29 }
  0x11   : > { %v239_v2 = vld [vmem:[%s206_s23] sm:$0xff]  ;;  %v240_v3 = vld [vmem:[%s206_s23 + $0x8] sm:$0xff]  ;;  %v241_v4 = vld [vmem:[%s206_s23 + $0x10] sm:$0xff]  ;;  %s845_s8 = scalar_lea.vmem %s891_s3, %s614_s29 }
  0x12   : > { %v668_v5 = vpack.c.bf16 %v240_v3, %v239_v2  ;;  %v242_v6 = vld [vmem:[%s206_s23 + $0x18] sm:$0xff] }
  0x13   : > { %v672_v7 = vpack.c.bf16 %v242_v6, %v241_v4 }
  0x14   : > { %669 = vmatprep.subr.bf16.mxu0 %v668_v5  ;;  %676 = vmatprep.subr.bf16.mxu1 %v668_v5 }
  0x15   : > { %671 = vmatpush3.bf16.msra.mxu0 %v668_v5  ;;  %678 = vmatpush3.bf16.msra.mxu1 %v668_v5 }
  0x16   : > { %673 = vmatprep.subr.bf16.mxu0 %v672_v7  ;;  %677 = vmatprep.subr.bf16.mxu1 %v672_v7 }
  0x19   : > { %675 = vmatpush3.bf16.msra.mxu0 %v672_v7  ;;  %679 = vmatpush3.bf16.msra.mxu1 %v672_v7 }
  0x1c   : > { %645 = vmatmul.mubr.msk.f32.vlgmr.msra.gmra.mrb[0].mxu0 %vm243_vm0, %v224_v8  ;;  %657 = vmatmul.mubr.msk.f32.vlgmr.msra.gmra.mrb[0].mxu1 %vm243_vm0, %v232_v9 }
  0x1d   : > { %647 = vmatprep.mubr.msk.f32.mxu0 %vm243_vm0, %v225_v10  ;;  %659 = vmatprep.mubr.msk.f32.mxu1 %vm243_vm0, %v233_v11 }
  0x20   : > { %648 = vmatmul.mubr.msk.f32.gmra.mrb[2].mxu0 %vm243_vm0, %v226_v12  ;;  %660 = vmatmul.mubr.msk.f32.gmra.mrb[2].mxu1 %vm243_vm0, %v234_v13 }
  0x21   : > { %650 = vmatprep.mubr.msk.f32.mxu0 %vm243_vm0, %v227_v14  ;;  %662 = vmatprep.mubr.msk.f32.mxu1 %vm243_vm0, %v235_v15 }
  0x24   : > { %651 = vmatmul.mubr.msk.f32.gmra.mrb[4].mxu0 %vm243_vm0, %v228_v16  ;;  %663 = vmatmul.mubr.msk.f32.gmra.mrb[4].mxu1 %vm243_vm0, %v236_v17 }
  0x25   : > { %653 = vmatprep.mubr.msk.f32.mxu0 %vm243_vm0, %v229_v18  ;;  %665 = vmatprep.mubr.msk.f32.mxu1 %vm243_vm0, %v237_v19 }
  0x28   : > { %654 = vmatmul.mubr.msk.f32.gmra.mrb[6].mxu0 %vm243_vm0, %v230_v20  ;;  %666 = vmatmul.mubr.msk.f32.gmra.mrb[6].mxu1 %vm243_vm0, %v238_v21 }
  0xef   : > { %v646_v22 = vpop.f32.mrb[0].mxu0  ;;  %v658_v23 = vpop.f32.mrb[0].mxu1 }
  0xf0   : > { %439 = vst.msk [vmem:[%s840_s5 + $0x8] sm:$0xff] %vm437_vm1, %v646_v22  ;;  %447 = vst.msk [vmem:[%s845_s8 + $0x8] sm:$0xff] %vm437_vm1, %v658_v23  ;;  %v358_v24 = vpop.f32.mrb[1].mxu0  ;;  %v398_v25 = vpop.f32.mrb[1].mxu1 }
  0xf1   : > { %438 = vst.msk [vmem:[%s840_s5] sm:$0xff] %vm437_vm1, %v358_v24  ;;  %446 = vst.msk [vmem:[%s845_s8] sm:$0xff] %vm437_vm1, %v398_v25 }
  0xf3   : > { %v649_v26 = vpop.f32.mrb[2].mxu0  ;;  %v661_v27 = vpop.f32.mrb[2].mxu1 }
  0xf4   : > { %441 = vst.msk [vmem:[%s840_s5 + $0x18] sm:$0xff] %vm437_vm1, %v649_v26  ;;  %449 = vst.msk [vmem:[%s845_s8 + $0x18] sm:$0xff] %vm437_vm1, %v661_v27  ;;  %v368_v28 = vpop.f32.mrb[3].mxu0  ;;  %v408_v29 = vpop.f32.mrb[3].mxu1 }
  0xf5   : > { %440 = vst.msk [vmem:[%s840_s5 + $0x10] sm:$0xff] %vm437_vm1, %v368_v28  ;;  %448 = vst.msk [vmem:[%s845_s8 + $0x10] sm:$0xff] %vm437_vm1, %v408_v29 }
  0xf7   : > { %v652_v30 = vpop.f32.mrb[4].mxu0  ;;  %v664_v31 = vpop.f32.mrb[4].mxu1 }
  0xf8   : > { %443 = vst.msk [vmem:[%s840_s5 + $0x28] sm:$0xff] %vm437_vm1, %v652_v30  ;;  %451 = vst.msk [vmem:[%s845_s8 + $0x28] sm:$0xff] %vm437_vm1, %v664_v31  ;;  %v378_v32 = vpop.f32.mrb[5].mxu0  ;;  %v418_v33 = vpop.f32.mrb[5].mxu1 }
  0xf9   : > { %442 = vst.msk [vmem:[%s840_s5 + $0x20] sm:$0xff] %vm437_vm1, %v378_v32  ;;  %450 = vst.msk [vmem:[%s845_s8 + $0x20] sm:$0xff] %vm437_vm1, %v418_v33 }
  0xfb   : > { %v655_v34 = vpop.f32.mrb[6].mxu0  ;;  %v667_v35 = vpop.f32.mrb[6].mxu1 }
  0xfc   : > { %445 = vst.msk [vmem:[%s840_s5 + $0x38] sm:$0xff] %vm437_vm1, %v655_v34  ;;  %453 = vst.msk [vmem:[%s845_s8 + $0x38] sm:$0xff] %vm437_vm1, %v667_v35  ;;  %v388_v36 = vpop.f32.mrb[7].mxu0  ;;  %v428_v37 = vpop.f32.mrb[7].mxu1 }
  0xfd   : > { %444 = vst.msk [vmem:[%s840_s5 + $0x30] sm:$0xff] %vm437_vm1, %v388_v36  ;;  %452 = vst.msk [vmem:[%s845_s8 + $0x30] sm:$0xff] %vm437_vm1, %v428_v37 }
  0xfe PF: > { %s14_s14 = sadd.s32 1, %s726_s14   ;;  %s892_s12 = smov %s722_s13 }
  0xff   : > { %p11_p5 = scmp.ge.s32.totalorder %s14_s14, 4   ;;  %s893_s13 = smov %s895_s15 }
 0x101   :  { %13 = sbr.rel (!%p11_p5) target bundleno = 2 (0x2), region = 70 }

</bundles_post_ra>
